<compile_context>
chip_gen: v7x
topology: tpu7x:2x2x1
jax: 0.10.0
libtpu: 0.0.40
codegen_flags: <defaults>
</compile_context>

<pallas_src>
import numpy as np
import jax
import jax.numpy as jnp
from jax import lax
from jax.experimental import pallas as pl
from jax.experimental.pallas import tpu as pltpu

BN_EPS = 1e-5


def _conv_block_kernel(x_ref, w1_ref, w2_ref, s_ref, sh1_ref, sh2_ref, out_ref):
    # x_ref:   (1, R, 3*W*Cin)       row-flattened, ky-im2col'ed input (R = bt*H rows)
    # w1_ref:  (3*W*Cin, W*Cout)     fully banded conv1 weights (ky & kx folded), BN-scaled
    # w2_ref:  (3, W*Cout, W*Cout)   banded conv2 weights (ky tap on axis 0), BN-scaled
    # s_ref:   (2, R, R)             block-diagonal row-shift matrices [down, up]
    # sh*_ref: (1, W*Cout)           folded bias + BN shift, tiled over W
    # out_ref: (1, R, W*Cout)        lane-dense output
    a = x_ref[0]

    # conv1 + BN + ReLU: single MXU matmul (ky/kx taps live in the lane axis of `a`).
    y = jnp.dot(a, w1_ref[...], preferred_element_type=jnp.float32)
    y = jnp.maximum(y + sh1_ref[...], 0.0)                      # (R, W*Cout), stays in vregs

    # conv2 + BN + ReLU: ky shifts (with height zero-padding and batch-boundary
    # blocking) via precomputed shift matrices on the MXU, kx taps in banded weights.
    y_dn = jnp.dot(s_ref[0], y, preferred_element_type=jnp.float32)   # row i <- y[i-1]
    y_up = jnp.dot(s_ref[1], y, preferred_element_type=jnp.float32)   # row i <- y[i+1]
    acc = jnp.dot(y_dn, w2_ref[0], preferred_element_type=jnp.float32)
    acc += jnp.dot(y, w2_ref[1], preferred_element_type=jnp.float32)
    acc += jnp.dot(y_up, w2_ref[2], preferred_element_type=jnp.float32)
    out_ref[0] = jnp.maximum(acc + sh2_ref[...], 0.0)           # lane-dense store


def _pick_batch_tile(B, H, cap_rows=512):
    """Largest divisor of B whose row count bt*H stays within a small sublane budget."""
    bt = 1
    for d in range(1, B + 1):
        if B % d == 0 and d * H <= cap_rows:
            bt = d
    return bt


def conv_block_forward(x_nchw, params):
    """conv-bn-relu-conv-bn-relu, matching PyTorch conv_block (eval-mode BN)."""
    B, cin, H, W = x_nchw.shape
    cout = params["w1"].shape[0]

    bt = _pick_batch_tile(B, H)       # batch elements per grid step
    R = bt * H                        # rows per grid step
    G = B // bt                       # grid length

    # ---- input layout plumbing (no FLOPs): NCHW -> NHWC, ky-shifted copies along lanes.
    x_nhwc = jnp.transpose(x_nchw, (0, 2, 3, 1)).astype(jnp.float32)       # (B,H,W,Cin)
    zrow = jnp.zeros((B, 1, W, cin), jnp.float32)
    x_dn = jnp.concatenate([zrow, x_nhwc[:, :-1]], axis=1)                 # row h <- x[h-1]
    x_up = jnp.concatenate([x_nhwc[:, 1:], zrow], axis=1)                  # row h <- x[h+1]
    x_im2 = jnp.stack([x_dn, x_nhwc, x_up], axis=2)                        # (B,H,3,W,Cin)
    x_rows = x_im2.reshape(G, R, 3 * W * cin)

    # ---- fold eval-mode BN into conv weights + per-channel shift.
    def fold(w_oihw, b, g, be, m, v):
        s = g / jnp.sqrt(v + BN_EPS)                               # (cout,)
        w_hwio = jnp.transpose(w_oihw, (2, 3, 1, 0)).astype(jnp.float32)
        w_hwio = w_hwio * s[None, None, None, :]                   # scale into weights
        shift = b * s + be - m * s                                 # bias*s + (beta - mean*s)
        return w_hwio, shift.astype(jnp.float32)

    w1, sh1 = fold(params["w1"], params["b1"], params["g1"], params["be1"],
                   params["m1"], params["v1"])
    w2, sh2 = fold(params["w2"], params["b2"], params["g2"], params["be2"],
                   params["m2"], params["v2"])

    # ---- banded ("row im2col") weights: kx taps + width zero-padding folded into a
    #      (W*ci, W*co) matrix per ky tap.
    band = np.zeros((3, W, W), np.float32)
    for dx in range(3):
        for j in range(W):
            jj = j + dx - 1
            if 0 <= jj < W:
                band[dx, jj, j] = 1.0
    band = jnp.asarray(band)

    # conv1: fold ky too -> single (3*W*cin, W*cout) matrix (matches lane layout of x_rows).
    wb1 = jnp.einsum("xuj,dxio->duijo", band, w1).reshape(3 * W * cin, W * cout)
    # conv2: ky tap kept on axis 0 (handled in-kernel via shift matrices).
    wb2 = jnp.einsum("xuj,dxio->duijo", band, w2).reshape(3, W * cout, W * cout)

    sh1_row = jnp.tile(sh1, W).reshape(1, W * cout)
    sh2_row = jnp.tile(sh2, W).reshape(1, W * cout)

    # ---- block-diagonal row-shift matrices (built once on host; DMA'd once).
    ri = np.arange(R)
    s_dn = np.zeros((R, R), np.float32)
    ok = (ri % H) != 0
    s_dn[ri[ok], ri[ok] - 1] = 1.0           # row i <- row i-1 (zero at image top)
    s_up = np.zeros((R, R), np.float32)
    ok = (ri % H) != (H - 1)
    s_up[ri[ok], ri[ok] + 1] = 1.0           # row i <- row i+1 (zero at image bottom)
    s2 = jnp.asarray(np.stack([s_dn, s_up]))  # (2, R, R)

    out_rows = pl.pallas_call(
        _conv_block_kernel,
        out_shape=jax.ShapeDtypeStruct((G, R, W * cout), jnp.float32),
        grid=(G,),
        in_specs=[
            pl.BlockSpec((1, R, 3 * W * cin), lambda g: (g, 0, 0)),
            pl.BlockSpec((3 * W * cin, W * cout), lambda g: (0, 0)),
            pl.BlockSpec((3, W * cout, W * cout), lambda g: (0, 0, 0)),
            pl.BlockSpec((2, R, R), lambda g: (0, 0, 0)),
            pl.BlockSpec((1, W * cout), lambda g: (0, 0)),
            pl.BlockSpec((1, W * cout), lambda g: (0, 0)),
        ],
        out_specs=pl.BlockSpec((1, R, W * cout), lambda g: (g, 0, 0)),
        compiler_params=pltpu.CompilerParams(dimension_semantics=("parallel",)),
    )(x_rows, wb1, wb2, s2, sh1_row, sh2_row)

    # (G, R, W*Cout) -> NCHW to match PyTorch output convention.
    return jnp.transpose(out_rows.reshape(B, H, W, cout), (0, 3, 1, 2))


def _reference_forward(x_nchw, p):
    """Pure-JAX reference (NCHW, eval-mode BN) for validation."""
    def conv(x, w, b):
        y = lax.conv_general_dilated(
            x, w, window_strides=(1, 1), padding=((1, 1), (1, 1)),
            dimension_numbers=("NCHW", "OIHW", "NCHW"))
        return y + b[None, :, None, None]

    def bn(x, g, be, m, v):
        return ((x - m[None, :, None, None])
                / jnp.sqrt(v[None, :, None, None] + BN_EPS)
                * g[None, :, None, None] + be[None, :, None, None])

    y = jax.nn.relu(bn(conv(x_nchw, p["w1"], p["b1"]), p["g1"], p["be1"], p["m1"], p["v1"]))
    y = jax.nn.relu(bn(conv(y, p["w2"], p["b2"]), p["g2"], p["be2"], p["m2"], p["v2"]))
    return y


def _init_params(key, cin, cout):
    ks = jax.random.split(key, 12)
    return {
        "w1": 0.1 * jax.random.normal(ks[0], (cout, cin, 3, 3), jnp.float32),
        "b1": 0.1 * jax.random.normal(ks[1], (cout,), jnp.float32),
        "g1": 1.0 + 0.1 * jax.random.normal(ks[2], (cout,), jnp.float32),
        "be1": 0.1 * jax.random.normal(ks[3], (cout,), jnp.float32),
        "m1": 0.05 * jax.random.normal(ks[4], (cout,), jnp.float32),
        "v1": 1.0 + 0.1 * jax.random.uniform(ks[5], (cout,), jnp.float32),
        "w2": 0.1 * jax.random.normal(ks[6], (cout, cout, 3, 3), jnp.float32),
        "b2": 0.1 * jax.random.normal(ks[7], (cout,), jnp.float32),
        "g2": 1.0 + 0.1 * jax.random.normal(ks[8], (cout,), jnp.float32),
        "be2": 0.1 * jax.random.normal(ks[9], (cout,), jnp.float32),
        "m2": 0.05 * jax.random.normal(ks[10], (cout,), jnp.float32),
        "v2": 1.0 + 0.1 * jax.random.uniform(ks[11], (cout,), jnp.float32),
    }


if __name__ == "__main__":
    B, CIN, COUT, H, W = 2, 4, 8, 16, 16
    key = jax.random.PRNGKey(0)
    kx, kp = jax.random.split(key)
    x = jax.random.normal(kx, (B, CIN, H, W), jnp.float32)
    params = _init_params(kp, CIN, COUT)

    fwd = jax.jit(lambda xin: conv_block_forward(xin, params))
    out = jax.block_until_ready(fwd(x))

    ref = _reference_forward(x, params)
    assert out.shape == (B, COUT, H, W)
    assert jnp.allclose(out, ref, rtol=1e-4, atol=1e-4), \
        f"max abs err = {jnp.max(jnp.abs(out - ref))}"
    print("KERNEL_OK")
</pallas_src>

<mosaic_0001>
module attributes {stable_mosaic.version = 11 : i64} {
  func.func @_conv_block_kernel(%arg0: i32, %arg1: memref<1x32x192xf32, #tpu.memory_space<vmem>>, %arg2: memref<192x128xf32, #tpu.memory_space<vmem>>, %arg3: memref<3x128x128xf32, #tpu.memory_space<vmem>>, %arg4: memref<2x32x32xf32, #tpu.memory_space<vmem>>, %arg5: memref<1x128xf32, #tpu.memory_space<vmem>>, %arg6: memref<1x128xf32, #tpu.memory_space<vmem>>, %arg7: memref<1x32x128xf32, #tpu.memory_space<vmem>>) attributes {dimension_semantics = [#tpu.dimension_semantics<parallel>], iteration_bounds = array<i64: 1>, scalar_prefetch = 0 : i64, scratch_operands = 0 : i64, tpu.core_type = #tpu.core_type<tc>, window_params = [{transform_indices = @transform_0, window_bounds = array<i64: 1, 32, 192>}, {pipeline_mode = #tpu.pipeline_mode<synchronous>, transform_indices = @transform_1, window_bounds = array<i64: 192, 128>}, {pipeline_mode = #tpu.pipeline_mode<synchronous>, transform_indices = @transform_2, window_bounds = array<i64: 3, 128, 128>}, {pipeline_mode = #tpu.pipeline_mode<synchronous>, transform_indices = @transform_3, window_bounds = array<i64: 2, 32, 32>}, {pipeline_mode = #tpu.pipeline_mode<synchronous>, transform_indices = @transform_4, window_bounds = array<i64: 1, 128>}, {pipeline_mode = #tpu.pipeline_mode<synchronous>, transform_indices = @transform_5, window_bounds = array<i64: 1, 128>}, {transform_indices = @transform_6, window_bounds = array<i64: 1, 32, 128>}]} {
    %c0 = arith.constant 0 : index
    %c0_0 = arith.constant 0 : index
    %c0_1 = arith.constant 0 : index
    %0 = vector.load %arg1[%c0, %c0_0, %c0_1] : memref<1x32x192xf32, #tpu.memory_space<vmem>>, vector<1x32x192xf32>
    %1 = vector.shape_cast %0 : vector<1x32x192xf32> to vector<32x192xf32>
    %c0_2 = arith.constant 0 : index
    %c0_3 = arith.constant 0 : index
    %2 = vector.load %arg2[%c0_2, %c0_3] : memref<192x128xf32, #tpu.memory_space<vmem>>, vector<192x128xf32>
    %cst = arith.constant dense<0.000000e+00> : vector<32x128xf32>
    %3 = tpu.matmul %1, %2, %cst {dimension_numbers = #tpu.dot_dimension_numbers<[1], [0], [0], [1], [0, 0, 1, 1], [], []>} : vector<32x192xf32>, vector<192x128xf32>, vector<32x128xf32> -> vector<32x128xf32>
    %c0_4 = arith.constant 0 : index
    %c0_5 = arith.constant 0 : index
    %4 = vector.load %arg5[%c0_4, %c0_5] : memref<1x128xf32, #tpu.memory_space<vmem>>, vector<1x128xf32>
    %5 = vector.broadcast %4 : vector<1x128xf32> to vector<32x128xf32>
    %6 = arith.addf %3, %5 : vector<32x128xf32>
    %cst_6 = arith.constant 0.000000e+00 : f32
    %7 = vector.broadcast %cst_6 : f32 to vector<32x128xf32>
    %8 = arith.maximumf %6, %7 : vector<32x128xf32>
    %c0_7 = arith.constant 0 : index
    %c0_8 = arith.constant 0 : index
    %c0_9 = arith.constant 0 : index
    %9 = vector.load %arg4[%c0_7, %c0_8, %c0_9] : memref<2x32x32xf32, #tpu.memory_space<vmem>>, vector<1x32x32xf32>
    %10 = vector.shape_cast %9 : vector<1x32x32xf32> to vector<32x32xf32>
    %cst_10 = arith.constant dense<0.000000e+00> : vector<32x128xf32>
    %11 = tpu.matmul %10, %8, %cst_10 {dimension_numbers = #tpu.dot_dimension_numbers<[1], [0], [0], [1], [0, 0, 1, 1], [], []>} : vector<32x32xf32>, vector<32x128xf32>, vector<32x128xf32> -> vector<32x128xf32>
    %c1 = arith.constant 1 : index
    %c0_11 = arith.constant 0 : index
    %c0_12 = arith.constant 0 : index
    %12 = vector.load %arg4[%c1, %c0_11, %c0_12] : memref<2x32x32xf32, #tpu.memory_space<vmem>>, vector<1x32x32xf32>
    %13 = vector.shape_cast %12 : vector<1x32x32xf32> to vector<32x32xf32>
    %cst_13 = arith.constant dense<0.000000e+00> : vector<32x128xf32>
    %14 = tpu.matmul %13, %8, %cst_13 {dimension_numbers = #tpu.dot_dimension_numbers<[1], [0], [0], [1], [0, 0, 1, 1], [], []>} : vector<32x32xf32>, vector<32x128xf32>, vector<32x128xf32> -> vector<32x128xf32>
    %c0_14 = arith.constant 0 : index
    %c0_15 = arith.constant 0 : index
    %c0_16 = arith.constant 0 : index
    %15 = vector.load %arg3[%c0_14, %c0_15, %c0_16] : memref<3x128x128xf32, #tpu.memory_space<vmem>>, vector<1x128x128xf32>
    %16 = vector.shape_cast %15 : vector<1x128x128xf32> to vector<128x128xf32>
    %cst_17 = arith.constant dense<0.000000e+00> : vector<32x128xf32>
    %17 = tpu.matmul %11, %16, %cst_17 {dimension_numbers = #tpu.dot_dimension_numbers<[1], [0], [0], [1], [0, 0, 1, 1], [], []>} : vector<32x128xf32>, vector<128x128xf32>, vector<32x128xf32> -> vector<32x128xf32>
    %c1_18 = arith.constant 1 : index
    %c0_19 = arith.constant 0 : index
    %c0_20 = arith.constant 0 : index
    %18 = vector.load %arg3[%c1_18, %c0_19, %c0_20] : memref<3x128x128xf32, #tpu.memory_space<vmem>>, vector<1x128x128xf32>
    %19 = vector.shape_cast %18 : vector<1x128x128xf32> to vector<128x128xf32>
    %cst_21 = arith.constant dense<0.000000e+00> : vector<32x128xf32>
    %20 = tpu.matmul %8, %19, %cst_21 {dimension_numbers = #tpu.dot_dimension_numbers<[1], [0], [0], [1], [0, 0, 1, 1], [], []>} : vector<32x128xf32>, vector<128x128xf32>, vector<32x128xf32> -> vector<32x128xf32>
    %21 = arith.addf %17, %20 : vector<32x128xf32>
    %c2 = arith.constant 2 : index
    %c0_22 = arith.constant 0 : index
    %c0_23 = arith.constant 0 : index
    %22 = vector.load %arg3[%c2, %c0_22, %c0_23] : memref<3x128x128xf32, #tpu.memory_space<vmem>>, vector<1x128x128xf32>
    %23 = vector.shape_cast %22 : vector<1x128x128xf32> to vector<128x128xf32>
    %cst_24 = arith.constant dense<0.000000e+00> : vector<32x128xf32>
    %24 = tpu.matmul %14, %23, %cst_24 {dimension_numbers = #tpu.dot_dimension_numbers<[1], [0], [0], [1], [0, 0, 1, 1], [], []>} : vector<32x128xf32>, vector<128x128xf32>, vector<32x128xf32> -> vector<32x128xf32>
    %25 = arith.addf %21, %24 : vector<32x128xf32>
    %c0_25 = arith.constant 0 : index
    %c0_26 = arith.constant 0 : index
    %26 = vector.load %arg6[%c0_25, %c0_26] : memref<1x128xf32, #tpu.memory_space<vmem>>, vector<1x128xf32>
    %27 = vector.broadcast %26 : vector<1x128xf32> to vector<32x128xf32>
    %28 = arith.addf %25, %27 : vector<32x128xf32>
    %cst_27 = arith.constant 0.000000e+00 : f32
    %29 = vector.broadcast %cst_27 : f32 to vector<32x128xf32>
    %30 = arith.maximumf %28, %29 : vector<32x128xf32>
    %c0_28 = arith.constant 0 : index
    %c0_29 = arith.constant 0 : index
    %c0_30 = arith.constant 0 : index
    %31 = vector.load %arg7[%c0_28, %c0_29, %c0_30] : memref<1x32x128xf32, #tpu.memory_space<vmem>>, vector<1x32x128xf32>
    %32 = vector.shape_cast %31 : vector<1x32x128xf32> to vector<32x128xf32>
    %33 = vector.shape_cast %30 : vector<32x128xf32> to vector<1x32x128xf32>
    tpu.vector_store %arg7[%c0_28, %c0_29, %c0_30], %33 {strides = array<i32>} : memref<1x32x128xf32, #tpu.memory_space<vmem>>, vector<1x32x128xf32>,
    return
  }
  func.func @transform_0(%arg0: i32) -> (i32, i32, i32) {
    %c0_i32 = arith.constant 0 : i32
    %c0_i32_0 = arith.constant 0 : i32
    %c0_i32_1 = arith.constant 0 : i32
    return %arg0, %c0_i32, %c0_i32_0 : i32, i32, i32
  }
  func.func @transform_1(%arg0: i32) -> (i32, i32) {
    %c0_i32 = arith.constant 0 : i32
    %c0_i32_0 = arith.constant 0 : i32
    %c0_i32_1 = arith.constant 0 : i32
    return %c0_i32, %c0_i32_0 : i32, i32
  }
  func.func @transform_2(%arg0: i32) -> (i32, i32, i32) {
    %c0_i32 = arith.constant 0 : i32
    %c0_i32_0 = arith.constant 0 : i32
    %c0_i32_1 = arith.constant 0 : i32
    %c0_i32_2 = arith.constant 0 : i32
    return %c0_i32, %c0_i32_0, %c0_i32_1 : i32, i32, i32
  }
  func.func @transform_3(%arg0: i32) -> (i32, i32, i32) {
    %c0_i32 = arith.constant 0 : i32
    %c0_i32_0 = arith.constant 0 : i32
    %c0_i32_1 = arith.constant 0 : i32
    %c0_i32_2 = arith.constant 0 : i32
    return %c0_i32, %c0_i32_0, %c0_i32_1 : i32, i32, i32
  }
  func.func @transform_4(%arg0: i32) -> (i32, i32) {
    %c0_i32 = arith.constant 0 : i32
    %c0_i32_0 = arith.constant 0 : i32
    %c0_i32_1 = arith.constant 0 : i32
    return %c0_i32, %c0_i32_0 : i32, i32
  }
  func.func @transform_5(%arg0: i32) -> (i32, i32) {
    %c0_i32 = arith.constant 0 : i32
    %c0_i32_0 = arith.constant 0 : i32
    %c0_i32_1 = arith.constant 0 : i32
    return %c0_i32, %c0_i32_0 : i32, i32
  }
  func.func @transform_6(%arg0: i32) -> (i32, i32, i32) {
    %c0_i32 = arith.constant 0 : i32
    %c0_i32_0 = arith.constant 0 : i32
    %c0_i32_1 = arith.constant 0 : i32
    return %arg0, %c0_i32, %c0_i32_0 : i32, i32, i32
  }
}

</mosaic_0001>

<bundles_post_ra>
// kernel: tile.10
= control target key start
LH: loop header
LB: loop body
LE: loop exit
PB: predicated region body
PF: predicated region fallthrough
CT: control target
= control target key end

     0   :  { %s28_s0 = inlined_call_operand.vmem [shape: f32[8], index: 0, kind: input, shape index: {}]   ;;  %s29_s1 = inlined_call_operand.vmem [shape: f32[16,8], index: 1, kind: output, shape index: {}]  }
   0x1   :  { %v4_v0 = vld [vmem:[%s28_s0] ss:$0 sm:$0xff] }
   0x2   :  { %5 = vst [vmem:[%s29_s1] sm:$0xff] %v4_v0  ;;  %8 = vst [vmem:[%s29_s1 + $0x8] sm:$0xff] %v4_v0 }

// kernel: tile.11
= control target key start
LH: loop header
LB: loop body
LE: loop exit
PB: predicated region body
PF: predicated region fallthrough
CT: control target
= control target key end

     0   :  { %s131_s10 = smov 120   ;;  %s132_s11 = smov 104   ;;  %vm3_vm0 = vcmask 64512   ;;  %vm9_vm1 = vcmask 1048512   ;;  %vm15_vm2 = vcmask 982912   ;;  %vm21_vm3 = vcmask 917312   ;;  %s207_s0 = inlined_call_operand.vmem [shape: f32[16,8], index: 0, kind: input, shape index: {}]   ;;  %s208_s1 = inlined_call_operand.vmem [shape: f32[1,128], index: 1, kind: output, shape index: {}]  }
   0x1   :  { %v101_v0 = vld [vmem:[%s207_s0 + $0xf] sm:$0x1]   ;;  %v103_v1 = vld [vmem:[%s207_s0 + $0xd] sm:$0x1]   ;;  %v102_v2 = vld [vmem:[%s207_s0 + $0xe] sm:$0x1]  }
   0x2   :  { %7 = vrot.lane.b32.xlu0 %v101_v0, %s131_s10  ;;  %19 = vrot.lane.b32.xlu1 %v103_v1, %s132_s11  ;;  %v104_v3 = vld [vmem:[%s207_s0 + $0xc] sm:$0x1]   ;;  %s133_s16 = smov 112   ;;  %s134_s17 = smov 96   ;;  %v105_v4 = vld [vmem:[%s207_s0 + $0xb] sm:$0x1]  }
   0x3   :  { %v106_v5 = vld [vmem:[%s207_s0 + $0xa] sm:$0x1]   ;;  %v2_v6 = vld [vmem:[%s207_s0] sm:$0x1]   ;;  %s135_s24 = smov 88   ;;  %s136_s25 = smov 80  }
   0x4   :  { %4 = vst.msk [vmem:[#allocation0] sm:$0x1] %vm3_vm0, %v2_v6   ;;  %v107_v7 = vld [vmem:[%s207_s0 + $0x9] sm:$0x1]   ;;  %v108_v8 = vld [vmem:[%s207_s0 + $0x8] sm:$0x1]  }
   0x5   :  { %s137_s30 = smov 72   ;;  %s138_s2 = smov 64   ;;  %v109_v9 = vld [vmem:[%s207_s0 + $0x7] sm:$0x1]   ;;  %v110_v10 = vld [vmem:[%s207_s0 + $0x6] sm:$0x1]  }
   0x6   :  { %13 = vrot.lane.b32.xlu0 %v102_v2, %s133_s16  ;;  %25 = vrot.lane.b32.xlu1 %v104_v3, %s134_s17  ;;  %s139_s7 = smov 56   ;;  %s140_s8 = smov 48   ;;  %v111_v11 = vld [vmem:[%s207_s0 + $0x5] sm:$0x1]   ;;  %v112_v12 = vld [vmem:[%s207_s0 + $0x4] sm:$0x1]  }
   0x7   :  { %s141_s13 = smov 40   ;;  %s142_s14 = smov 32   ;;  %v113_v13 = vld [vmem:[%s207_s0 + $0x3] sm:$0x1]   ;;  %v114_v14 = vld [vmem:[%s207_s0 + $0x2] sm:$0x1]  }
   0x8   :  { %s143_s19 = smov 24   ;;  %s144_s20 = smov 16   ;;  %v115_v15 = vld [vmem:[%s207_s0 + $0x1] sm:$0x1]   ;;  %vm27_vm4 = vcmask 851712   ;;  %vm33_vm5 = vcmask 786112  }
   0x9   :  { %s145_s0 = smov 8   ;;  %vm39_vm6 = vcmask 720512   ;;  %vm45_vm7 = vcmask 654912   ;;  %vm51_vm8 = vcmask 589312   ;;  %vm57_vm9 = vcmask 523712  }
   0xa   :  { %31 = vrot.lane.b32.xlu0 %v105_v4, %s135_s24  ;;  %37 = vrot.lane.b32.xlu1 %v106_v5, %s136_s25  ;;  %vm63_vm10 = vcmask 458112   ;;  %vm69_vm11 = vcmask 392512   ;;  %vm75_vm12 = vcmask 326912   ;;  %vm81_vm13 = vcmask 261312  }
   0xb   :  { %vm87_vm14 = vcmask 195712   ;;  %vm93_vm15 = vcmask 130112  }
   0xe   :  { %43 = vrot.lane.b32.xlu0 %v107_v7, %s137_s30  ;;  %49 = vrot.lane.b32.xlu1 %v108_v8, %s138_s2 }
  0x12   :  { %55 = vrot.lane.b32.xlu0 %v109_v9, %s139_s7  ;;  %61 = vrot.lane.b32.xlu1 %v110_v10, %s140_s8 }
  0x16   :  { %67 = vrot.lane.b32.xlu0 %v111_v11, %s141_s13  ;;  %73 = vrot.lane.b32.xlu1 %v112_v12, %s142_s14 }
  0x1a   :  { %79 = vrot.lane.b32.xlu0 %v113_v13, %s143_s19  ;;  %85 = vrot.lane.b32.xlu1 %v114_v14, %s144_s20 }
  0x1e   :  { %91 = vrot.lane.b32.xlu0 %v115_v15, %s145_s0 }
  0x74   :  { %v8_v16 = vpop.permute.xlu0 %7   ;;  %v20_v17 = vpop.permute.xlu1 %19  }
  0x75   :  { %10 = vst.msk [vmem:[#allocation0] sm:$0x1] %vm9_vm1, %v8_v16  }
  0x78   :  { %v14_v18 = vpop.permute.xlu0 %13   ;;  %v26_v19 = vpop.permute.xlu1 %25  }
  0x79   :  { %16 = vst.msk [vmem:[#allocation0] sm:$0x1] %vm15_vm2, %v14_v18  }
  0x7a   :  { %22 = vst.msk [vmem:[#allocation0] sm:$0x1] %vm21_vm3, %v20_v17  }
  0x7b   :  { %28 = vst.msk [vmem:[#allocation0] sm:$0x1] %vm27_vm4, %v26_v19  }
  0x7c   :  { %v32_v20 = vpop.permute.xlu0 %31   ;;  %v38_v21 = vpop.permute.xlu1 %37  }
  0x7d   :  { %34 = vst.msk [vmem:[#allocation0] sm:$0x1] %vm33_vm5, %v32_v20  }
  0x7e   :  { %40 = vst.msk [vmem:[#allocation0] sm:$0x1] %vm39_vm6, %v38_v21  }
  0x80   :  { %v44_v22 = vpop.permute.xlu0 %43   ;;  %v50_v23 = vpop.permute.xlu1 %49  }
  0x81   :  { %46 = vst.msk [vmem:[#allocation0] sm:$0x1] %vm45_vm7, %v44_v22  }
  0x82   :  { %52 = vst.msk [vmem:[#allocation0] sm:$0x1] %vm51_vm8, %v50_v23  }
  0x84   :  { %v56_v24 = vpop.permute.xlu0 %55   ;;  %v62_v25 = vpop.permute.xlu1 %61  }
  0x85   :  { %58 = vst.msk [vmem:[#allocation0] sm:$0x1] %vm57_vm9, %v56_v24  }
  0x86   :  { %64 = vst.msk [vmem:[#allocation0] sm:$0x1] %vm63_vm10, %v62_v25  }
  0x88   :  { %v68_v26 = vpop.permute.xlu0 %67   ;;  %v74_v27 = vpop.permute.xlu1 %73  }
  0x89   :  { %70 = vst.msk [vmem:[#allocation0] sm:$0x1] %vm69_vm11, %v68_v26  }
  0x8a   :  { %76 = vst.msk [vmem:[#allocation0] sm:$0x1] %vm75_vm12, %v74_v27  }
  0x8c   :  { %v80_v28 = vpop.permute.xlu0 %79   ;;  %v86_v29 = vpop.permute.xlu1 %85  }
  0x8d   :  { %82 = vst.msk [vmem:[#allocation0] sm:$0x1] %vm81_vm13, %v80_v28  }
  0x8e   :  { %88 = vst.msk [vmem:[#allocation0] sm:$0x1] %vm87_vm14, %v86_v29  }
  0x90   :  { %v92_v30 = vpop.permute.xlu0 %91  }
  0x91   :  { %94 = vst.msk [vmem:[#allocation0] sm:$0x1] %vm93_vm15, %v92_v30  }
  0x98   :  { %v98_v31 = vld [vmem:[#allocation0] sm:$0x1] }
  0x99   :  { %100 = vst [vmem:[%s208_s1] sm:$0x1] %v98_v31 }

// kernel: _lambda_.1
= control target key start
LH: loop header
LB: loop body
LE: loop exit
PB: predicated region body
PF: predicated region fallthrough
CT: control target
= control target key end

     0   :  { %v1125_v0 = vmov 0.0|0.0   ;;  %vm62_vm0 = vcmask 523264   ;;  %vm168_vm1 = vcmask 261120   ;;  %s1473_s1 = inlined_call_operand.vmem [shape: f32[192,128], index: 1, kind: input, shape index: {}]   ;;  %s1474_s0 = inlined_call_operand.vmem [shape: f32[1,32,192], index: 0, kind: input, shape index: {}]   ;;  %s1475_s2 = inlined_call_operand.vmem [shape: f32[3,128,128], index: 2, kind: input, shape index: {}]   ;;  %s1476_s3 = inlined_call_operand.vmem [shape: f32[2,32,32], index: 3, kind: input, shape index: {}]   ;;  %s1477_s4 = inlined_call_operand.vmem [shape: f32[1,128], index: 4, kind: input, shape index: {}]   ;;  %s1478_s5 = inlined_call_operand.vmem [shape: f32[1,128], index: 5, kind: input, shape index: {}]   ;;  %s1479_s6 = inlined_call_operand.vmem [shape: f32[1,32,128], index: 6, kind: output, shape index: {}]  }
   0x1   :  { %968 = vmatprep.subr.bf16.mxu0 %v1125_v0  ;;  %v31_v1 = vld [vmem:[%s1473_s1] sm:$0xff]  ;;  %v32_v2 = vld [vmem:[%s1473_s1 + $0x8] sm:$0xff]  ;;  %v33_v3 = vld [vmem:[%s1473_s1 + $0x10] sm:$0xff] }
   0x2   :  { %v969_v4 = vpack.c.bf16 %v32_v2, %v31_v1  ;;  %v34_v5 = vld [vmem:[%s1473_s1 + $0x18] sm:$0xff]  ;;  %v35_v7 = vld [vmem:[%s1473_s1 + $0x20] sm:$0xff]  ;;  %v36_v8 = vld [vmem:[%s1473_s1 + $0x28] sm:$0xff] }
   0x3   :  { %v972_v6 = vpack.c.bf16 %v34_v5, %v33_v3  ;;  %v975_v9 = vpack.c.bf16 %v36_v8, %v35_v7  ;;  %v37_v10 = vld [vmem:[%s1473_s1 + $0x30] sm:$0xff]  ;;  %v38_v11 = vld [vmem:[%s1473_s1 + $0x38] sm:$0xff]  ;;  %v24_v12 = vld [vmem:[%s1474_s0 + $0x8] sm:$0xff] }
   0x4   :  { %970 = vmatpush1.bf16.msra.mxu0 %v969_v4  ;;  %701 = vmatprep.mubr.msk.f32.mxu0 %vm62_vm0, %v24_v12  ;;  %v978_v13 = vpack.c.bf16 %v38_v11, %v37_v10  ;;  %v39_v14 = vld [vmem:[%s1473_s1 + $0x40] sm:$0xff]  ;;  %v40_v15 = vld [vmem:[%s1473_s1 + $0x48] sm:$0xff]  ;;  %v41_v17 = vld [vmem:[%s1473_s1 + $0x50] sm:$0xff] }
   0x5   :  { %971 = vmatprep.subr.bf16.mxu0 %v1125_v0  ;;  %v981_v16 = vpack.c.bf16 %v40_v15, %v39_v14  ;;  %v42_v18 = vld [vmem:[%s1473_s1 + $0x58] sm:$0xff]  ;;  %v43_v20 = vld [vmem:[%s1473_s1 + $0x60] sm:$0xff]  ;;  %v44_v21 = vld [vmem:[%s1473_s1 + $0x68] sm:$0xff] }
   0x6   :  { %v984_v19 = vpack.c.bf16 %v42_v18, %v41_v17  ;;  %v987_v22 = vpack.c.bf16 %v44_v21, %v43_v20  ;;  %v45_v23 = vld [vmem:[%s1473_s1 + $0x70] sm:$0xff]  ;;  %v46_v24 = vld [vmem:[%s1473_s1 + $0x78] sm:$0xff]  ;;  %v47_v26 = vld [vmem:[%s1473_s1 + $0x80] sm:$0xff] }
   0x7   :  { %v990_v25 = vpack.c.bf16 %v46_v24, %v45_v23  ;;  %v48_v27 = vld [vmem:[%s1473_s1 + $0x88] sm:$0xff]  ;;  %v49_v29 = vld [vmem:[%s1473_s1 + $0x90] sm:$0xff]  ;;  %v50_v30 = vld [vmem:[%s1473_s1 + $0x98] sm:$0xff] }
   0x8   :  { %973 = vmatpush1.bf16.msra.mxu0 %v972_v6  ;;  %v993_v28 = vpack.c.bf16 %v48_v27, %v47_v26  ;;  %v996_v31 = vpack.c.bf16 %v50_v30, %v49_v29  ;;  %v51_v32 = vld [vmem:[%s1473_s1 + $0xa0] sm:$0xff]  ;;  %v52_v33 = vld [vmem:[%s1473_s1 + $0xa8] sm:$0xff]  ;;  %v53_v35 = vld [vmem:[%s1473_s1 + $0xb0] sm:$0xff] }
   0x9   :  { %974 = vmatprep.subr.bf16.mxu0 %v1125_v0  ;;  %v999_v34 = vpack.c.bf16 %v52_v33, %v51_v32  ;;  %v54_v36 = vld [vmem:[%s1473_s1 + $0xb8] sm:$0xff]  ;;  %v717_v37 = vld [vmem:[%s1475_s2 + $0x80] sm:$0xff]  ;;  %v718_v38 = vld [vmem:[%s1475_s2 + $0x88] sm:$0xff] }
   0xa   :  { %v1002_v39 = vpack.c.bf16 %v54_v36, %v53_v35  ;;  %v1020_v40 = vpack.c.bf16 %v718_v38, %v717_v37  ;;  %v719_v41 = vld [vmem:[%s1475_s2 + $0x90] sm:$0xff]  ;;  %v720_v42 = vld [vmem:[%s1475_s2 + $0x98] sm:$0xff]  ;;  %v23_v43 = vld [vmem:[%s1474_s0] sm:$0xff] }
   0xb   :  { %v26_v44 = vld [vmem:[%s1474_s0 + $0x18] sm:$0xff]  ;;  %v1024_v45 = vpack.c.bf16 %v720_v42, %v719_v41  ;;  %v721_v46 = vld [vmem:[%s1475_s2 + $0xa0] sm:$0xff]  ;;  %v722_v47 = vld [vmem:[%s1475_s2 + $0xa8] sm:$0xff] }
   0xc   :  { %976 = vmatpush1.bf16.msra.mxu0 %v975_v9  ;;  %v25_v48 = vld [vmem:[%s1474_s0 + $0x10] sm:$0xff]  ;;  %v28_v49 = vld [vmem:[%s1474_s0 + $0x28] sm:$0xff]  ;;  %v1028_v50 = vpack.c.bf16 %v722_v47, %v721_v46  ;;  %v724_v52 = vld [vmem:[%s1475_s2 + $0xb8] sm:$0xff] }
   0xd   :  { %977 = vmatprep.subr.bf16.mxu0 %v1125_v0  ;;  %v723_v51 = vld [vmem:[%s1475_s2 + $0xb0] sm:$0xff]  ;;  %v27_v53 = vld [vmem:[%s1474_s0 + $0x20] sm:$0xff]  ;;  %v30_v54 = vld [vmem:[%s1474_s0 + $0x38] sm:$0xff] }
   0xe   :  { %v1032_v55 = vpack.c.bf16 %v724_v52, %v723_v51  ;;  %v725_v56 = vld [vmem:[%s1475_s2 + $0xc0] sm:$0xff]  ;;  %v726_v57 = vld [vmem:[%s1475_s2 + $0xc8] sm:$0xff]  ;;  %v29_v58 = vld [vmem:[%s1474_s0 + $0x30] sm:$0xff] }
   0xf   :  { %v1036_v59 = vpack.c.bf16 %v726_v57, %v725_v56  ;;  %v727_v60 = vld [vmem:[%s1475_s2 + $0xd0] sm:$0xff]  ;;  %v728_v61 = vld [vmem:[%s1475_s2 + $0xd8] sm:$0xff]  ;;  %v729_v63 = vld [vmem:[%s1475_s2 + $0xe0] sm:$0xff] }
  0x10   :  { %979 = vmatpush1.bf16.msra.mxu0 %v978_v13  ;;  %v1040_v62 = vpack.c.bf16 %v728_v61, %v727_v60  ;;  %v731_v2 = vld [vmem:[%s1475_s2 + $0xf0] sm:$0xff]  ;;  %v732_v3 = vld [vmem:[%s1475_s2 + $0xf8] sm:$0xff]  ;;  %v164_v5 = vld [vmem:[%s1476_s3] sm:$0xff] }
  0x11   :  { %980 = vmatprep.subr.bf16.mxu0 %v1125_v0  ;;  %v1048_v4 = vpack.c.bf16 %v732_v3, %v731_v2  ;;  %834 = vmatprep.mubr.msk.f32.mxu1 %vm168_vm1, %v164_v5  ;;  %v700_v6 = vld [vmem:[%s1477_s4] ss:$0 sm:$0xff]  ;;  %v166_v26 = vld [vmem:[%s1476_s3 + $0x10] sm:$0xff]  ;;  %v167_v29 = vld [vmem:[%s1476_s3 + $0x18] sm:$0xff] }
  0x12   :  { %v368_v27 = vld [vmem:[%s1475_s2] sm:$0xff]  ;;  %v370_v32 = vld [vmem:[%s1475_s2 + $0x10] sm:$0xff]  ;;  %v371_v33 = vld [vmem:[%s1475_s2 + $0x18] sm:$0xff] }
  0x13   :  { %v709_v30 = vld [vmem:[%s1476_s3 + $0x20] sm:$0xff]  ;;  %v711_v35 = vld [vmem:[%s1476_s3 + $0x30] sm:$0xff]  ;;  %v1056_v36 = vpack.c.bf16 %v371_v33, %v370_v32  ;;  %v373_v38 = vld [vmem:[%s1475_s2 + $0x28] sm:$0xff] }
  0x14   :  { %982 = vmatpush1.bf16.msra.mxu0 %v981_v16  ;;  %v372_v37 = vld [vmem:[%s1475_s2 + $0x20] sm:$0xff]  ;;  %v374_v41 = vld [vmem:[%s1475_s2 + $0x30] sm:$0xff]  ;;  %v375_v42 = vld [vmem:[%s1475_s2 + $0x38] sm:$0xff] }
  0x15   :  { %983 = vmatprep.subr.bf16.mxu0 %v1125_v0  ;;  %v378_v47 = vld [vmem:[%s1475_s2 + $0x50] sm:$0xff]  ;;  %v381_v51 = vld [vmem:[%s1475_s2 + $0x68] sm:$0xff]  ;;  %v733_v56 = vld [vmem:[%s1475_s2 + $0x100] sm:$0xff] }
  0x16   :  { %v734_v57 = vld [vmem:[%s1475_s2 + $0x108] sm:$0xff] }
  0x17   :  { %v738_v5 = vld [vmem:[%s1475_s2 + $0x128] sm:$0xff] }
  0x18   :  { %985 = vmatpush1.bf16.msra.mxu0 %v984_v19 }
  0x19   :  { %986 = vmatprep.subr.bf16.mxu0 %v1125_v0 }
  0x1c   :  { %988 = vmatpush1.bf16.msra.mxu0 %v987_v22 }
  0x1d   :  { %989 = vmatprep.subr.bf16.mxu0 %v1125_v0 }
  0x20   :  { %991 = vmatpush1.bf16.msra.mxu0 %v990_v25  ;;  %v165_v25 = vld [vmem:[%s1476_s3 + $0x8] sm:$0xff] }
  0x21   :  { %992 = vmatprep.subr.bf16.mxu0 %v1125_v0 }
  0x24   :  { %994 = vmatpush1.bf16.msra.mxu0 %v993_v28  ;;  %v369_v28 = vld [vmem:[%s1475_s2 + $0x8] sm:$0xff] }
  0x25   :  { %995 = vmatprep.subr.bf16.mxu0 %v1125_v0 }
  0x28   :  { %997 = vmatpush1.bf16.msra.mxu0 %v996_v31  ;;  %v1052_v31 = vpack.c.bf16 %v369_v28, %v368_v27 }
  0x29   :  { %998 = vmatprep.subr.bf16.mxu0 %v1125_v0 }
  0x2c   :  { %1000 = vmatpush1.bf16.msra.mxu0 %v999_v34  ;;  %v710_v34 = vld [vmem:[%s1476_s3 + $0x28] sm:$0xff] }
  0x2d   :  { %1001 = vmatprep.subr.bf16.mxu0 %v1125_v0  ;;  %v730_v0 = vld [vmem:[%s1475_s2 + $0xe8] sm:$0xff] }
  0x2e   :  { %v1044_v1 = vpack.c.bf16 %v730_v0, %v729_v63  ;;  %v735_v63 = vld [vmem:[%s1475_s2 + $0x110] sm:$0xff]  ;;  %v736_v0 = vld [vmem:[%s1475_s2 + $0x118] sm:$0xff] }
  0x2f   :  { %v1088_v3 = vpack.c.bf16 %v736_v0, %v735_v63 }
  0x30   :  { %1003 = vmatpush1.bf16.msra.mxu0 %v1002_v39  ;;  %v712_v39 = vld [vmem:[%s1476_s3 + $0x38] sm:$0xff] }
  0x31   :  { %1021 = vmatprep.subr.bf16.mxu0 %v1020_v40 }
  0x33   :  { %140 = vmatmul.mubr.f32.vlgmr.msra.gmra.mrb[0].mxu0 %v23_v43  ;;  %v1064_v43 = vpack.c.bf16 %v375_v42, %v374_v41 }
  0x34   :  { %702 = vmatprep.mubr.msk.f32.mxu0 %vm62_vm0, %v26_v44  ;;  %1023 = vmatpush3.bf16.msra.mxu0 %v1020_v40  ;;  %v1060_v40 = vpack.c.bf16 %v373_v38, %v372_v37  ;;  %v376_v44 = vld [vmem:[%s1475_s2 + $0x40] sm:$0xff] }
  0x35   :  { %1025 = vmatprep.subr.bf16.mxu0 %v1024_v45 }
  0x37   :  { %145 = vmatmul.mubr.f32.gmra.mrb[2].mxu0 %v25_v48  ;;  %v379_v48 = vld [vmem:[%s1475_s2 + $0x58] sm:$0xff] }
  0x38   :  { %703 = vmatprep.mubr.msk.f32.mxu0 %vm62_vm0, %v28_v49  ;;  %1027 = vmatpush3.bf16.msra.mxu0 %v1024_v45  ;;  %v377_v45 = vld [vmem:[%s1475_s2 + $0x48] sm:$0xff]  ;;  %v1072_v49 = vpack.c.bf16 %v379_v48, %v378_v47 }
  0x39   :  { %1029 = vmatprep.subr.bf16.mxu0 %v1028_v50  ;;  %v1068_v46 = vpack.c.bf16 %v377_v45, %v376_v44 }
  0x3b   :  { %150 = vmatmul.mubr.f32.gmra.mrb[4].mxu0 %v27_v53  ;;  %v382_v53 = vld [vmem:[%s1475_s2 + $0x70] sm:$0xff] }
  0x3c   :  { %704 = vmatprep.mubr.msk.f32.mxu0 %vm62_vm0, %v30_v54  ;;  %1031 = vmatpush3.bf16.msra.mxu0 %v1028_v50  ;;  %v380_v50 = vld [vmem:[%s1475_s2 + $0x60] sm:$0xff]  ;;  %v383_v54 = vld [vmem:[%s1475_s2 + $0x78] sm:$0xff] }
  0x3d   :  { %1033 = vmatprep.subr.bf16.mxu0 %v1032_v55  ;;  %v1076_v52 = vpack.c.bf16 %v381_v51, %v380_v50 }
  0x3f   :  { %155 = vmatmul.mubr.f32.gmra.mrb[6].mxu0 %v29_v58  ;;  %v1084_v58 = vpack.c.bf16 %v734_v57, %v733_v56 }
  0x40   :  { %1035 = vmatpush3.bf16.msra.mxu0 %v1032_v55  ;;  %v1080_v55 = vpack.c.bf16 %v383_v54, %v382_v53 }
  0x41   :  { %1037 = vmatprep.subr.bf16.mxu0 %v1036_v59 }
  0x44   :  { %1039 = vmatpush3.bf16.msra.mxu0 %v1036_v59 }
  0x45   :  { %1041 = vmatprep.subr.bf16.mxu0 %v1040_v62 }
  0x48   :  { %1043 = vmatpush3.bf16.msra.mxu0 %v1040_v62 }
  0x49   :  { %1045 = vmatprep.subr.bf16.mxu0 %v1044_v1 }
  0x4c   :  { %1047 = vmatpush3.bf16.msra.mxu0 %v1044_v1 }
  0x4d   :  { %1049 = vmatprep.subr.bf16.mxu0 %v1048_v4 }
  0x50   :  { %1051 = vmatpush3.bf16.msra.mxu0 %v1048_v4  ;;  %v737_v4 = vld [vmem:[%s1475_s2 + $0x120] sm:$0xff] }
 0x106   :  { %v141_v7 = vpop.f32.mrb[0].mxu0 }
 0x107   :  { %v142_v8 = vadd.f32 %v700_v6, %v141_v7  ;;  %v143_v9 = vpop.f32.mrb[1].mxu0  ;;  %v1092_v7 = vpack.c.bf16 %v738_v5, %v737_v4 }
 0x108   :  { %v739_v9 = vld [vmem:[%s1475_s2 + $0x130] sm:$0xff] }
 0x109   :  { %v160_v10 = vmax.f32 %v142_v8, 0.0 }
 0x10a   :  { %v146_v11 = vpop.f32.mrb[2].mxu0 }
 0x10b   :  { %v147_v12 = vadd.f32 %v700_v6, %v146_v11  ;;  %v148_v13 = vpop.f32.mrb[3].mxu0  ;;  %886 = vmatprep.mubr.f32.mxu0 %v160_v10 }
 0x10d   :  { %v161_v14 = vmax.f32 %v147_v12, 0.0 }
 0x10e   :  { %v151_v15 = vpop.f32.mrb[4].mxu0 }
 0x10f   :  { %v1004_v16 = vpack.c.bf16 %v161_v14, %v160_v10  ;;  %v152_v17 = vadd.f32 %v700_v6, %v151_v15  ;;  %v153_v18 = vpop.f32.mrb[5].mxu0  ;;  %887 = vmatmul.mubr.f32.vlgmr.msra.gmra.mrb[8].mxu0 %v161_v14  ;;  %v740_v10 = vld [vmem:[%s1475_s2 + $0x138] sm:$0xff]  ;;  %v741_v14 = vld [vmem:[%s1475_s2 + $0x140] sm:$0xff]  ;;  %v742_v15 = vld [vmem:[%s1475_s2 + $0x148] sm:$0xff] }
 0x110   :  { %v1096_v12 = vpack.c.bf16 %v740_v10, %v739_v9 }
 0x111   :  { %v162_v19 = vmax.f32 %v152_v17, 0.0  ;;  %1005 = vmatprep.subr.bf16.mxu1 %v1004_v16  ;;  %v1100_v17 = vpack.c.bf16 %v742_v15, %v741_v14 }
 0x112   :  { %v156_v20 = vpop.f32.mrb[6].mxu0  ;;  %1007 = vmatpush3.bf16.msra.mxu1 %v1004_v16 }
 0x113   :  { %v157_v21 = vadd.f32 %v700_v6, %v156_v20  ;;  %v158_v22 = vpop.f32.mrb[7].mxu0  ;;  %889 = vmatprep.mubr.f32.mxu0 %v162_v19  ;;  %v744_v20 = vld [vmem:[%s1475_s2 + $0x158] sm:$0xff] }
 0x114   :  { %v745_v22 = vld [vmem:[%s1475_s2 + $0x160] sm:$0xff] }
 0x115   :  { %v163_v23 = vmax.f32 %v157_v21, 0.0 }
 0x117   :  { %v1008_v24 = vpack.c.bf16 %v163_v23, %v162_v19  ;;  %890 = vmatmul.mubr.f32.gmra.mrb[10].mxu0 %v163_v23  ;;  %v743_v19 = vld [vmem:[%s1475_s2 + $0x150] sm:$0xff]  ;;  %v746_v23 = vld [vmem:[%s1475_s2 + $0x168] sm:$0xff] }
 0x118   :  { %v1104_v21 = vpack.c.bf16 %v744_v20, %v743_v19 }
 0x119   :  { %1009 = vmatprep.subr.bf16.mxu1 %v1008_v24 }
 0x11a   :  { %1011 = vmatpush3.bf16.msra.mxu1 %v1008_v24 }
 0x11b   :  { %1013 = vmatprep.subr.bf16.mxu1 %v1004_v16 }
 0x11d   :  { %835 = vmatmul.mubr.msk.f32.vlgmr.msra.gmra.mrb[0].mxu1 %vm168_vm1, %v165_v25  ;;  %v747_v25 = vld [vmem:[%s1475_s2 + $0x170] sm:$0xff] }
 0x11e   :  { %1015 = vmatpush3.bf16.msra.mxu1 %v1004_v16  ;;  %837 = vmatprep.mubr.msk.f32.mxu1 %vm168_vm1, %v166_v26  ;;  %v748_v26 = vld [vmem:[%s1475_s2 + $0x178] sm:$0xff] }
 0x11f   :  { %1017 = vmatprep.subr.bf16.mxu1 %v1008_v24  ;;  %v1112_v27 = vpack.c.bf16 %v748_v26, %v747_v25 }
 0x121   :  { %838 = vmatmul.mubr.msk.f32.gmra.mrb[2].mxu1 %vm168_vm1, %v167_v29  ;;  %v749_v29 = vld [vmem:[%s1478_s5] ss:$0 sm:$0xff] }
 0x122   :  { %1019 = vmatpush3.bf16.msra.mxu1 %v1008_v24  ;;  %848 = vmatprep.mubr.msk.f32.mxu1 %vm168_vm1, %v709_v30  ;;  %v1108_v24 = vpack.c.bf16 %v746_v23, %v745_v22 }
 0x123   :  { %1053 = vmatprep.subr.bf16.mxu1 %v1052_v31 }
 0x125   :  { %849 = vmatmul.mubr.msk.f32.vlgmr.msra.gmra.mrb[4].mxu1 %vm168_vm1, %v710_v34 }
 0x126   :  { %851 = vmatprep.mubr.msk.f32.mxu1 %vm168_vm1, %v711_v35  ;;  %1055 = vmatpush3.bf16.msra.mxu1 %v1052_v31 }
 0x127   :  { %1057 = vmatprep.subr.bf16.mxu1 %v1056_v36 }
 0x129   :  { %852 = vmatmul.mubr.msk.f32.gmra.mrb[6].mxu1 %vm168_vm1, %v712_v39 }
 0x12a   :  { %1059 = vmatpush3.bf16.msra.mxu1 %v1056_v36 }
 0x12b   :  { %1061 = vmatprep.subr.bf16.mxu1 %v1060_v40 }
 0x12e   :  { %1063 = vmatpush3.bf16.msra.mxu1 %v1060_v40 }
 0x12f   :  { %1065 = vmatprep.subr.bf16.mxu1 %v1064_v43 }
 0x132   :  { %1067 = vmatpush3.bf16.msra.mxu1 %v1064_v43 }
 0x133   :  { %1069 = vmatprep.subr.bf16.mxu1 %v1068_v46 }
 0x136   :  { %1071 = vmatpush3.bf16.msra.mxu1 %v1068_v46 }
 0x137   :  { %1073 = vmatprep.subr.bf16.mxu1 %v1072_v49 }
 0x13a   :  { %1075 = vmatpush3.bf16.msra.mxu1 %v1072_v49 }
 0x13b   :  { %1077 = vmatprep.subr.bf16.mxu1 %v1076_v52 }
 0x13e   :  { %1079 = vmatpush3.bf16.msra.mxu1 %v1076_v52 }
 0x13f   :  { %1081 = vmatprep.subr.bf16.mxu1 %v1080_v55 }
 0x142   :  { %1083 = vmatpush3.bf16.msra.mxu1 %v1080_v55 }
 0x143   :  { %1085 = vmatprep.subr.bf16.mxu1 %v1084_v58 }
 0x1e2   :  { %v888_v59 = vpop.f32.mrb[8].mxu0 }
 0x1e3   :  { %v467_v60 = vpop.f32.mrb[9].mxu0 }
 0x1ea   :  { %v1410_v61 = vpop.f32.mrb[10].mxu0 }
 0x1eb   :  { %v1412_v62 = vpop.f32.mrb[11].mxu0 }
 0x1f0   :  { %v836_v1 = vpop.f32.mrb[0].mxu1 }
 0x1f1   :  { %v247_v2 = vpop.f32.mrb[1].mxu1 }
 0x1f2   :  { %924 = vmatprep.mubr.f32.mxu1 %v247_v2 }
 0x1f3   :  { %925 = vmatmul.mubr.f32.vlgmr.msra.gmra.mrb[8].mxu1 %v836_v1 }
 0x1f4   :  { %1087 = vmatpush3.bf16.msra.mxu1 %v1084_v58  ;;  %v839_v6 = vpop.f32.mrb[2].mxu1 }
 0x1f5   :  { %1089 = vmatprep.subr.bf16.mxu1 %v1088_v3  ;;  %v257_v8 = vpop.f32.mrb[3].mxu1 }
 0x1f6   :  { %927 = vmatprep.mubr.f32.mxu1 %v257_v8 }
 0x1f7   :  { %928 = vmatmul.mubr.f32.gmra.mrb[10].mxu1 %v839_v6 }
 0x1f8   :  { %1091 = vmatpush3.bf16.msra.mxu1 %v1088_v3  ;;  %v850_v11 = vpop.f32.mrb[4].mxu1 }
 0x1f9   :  { %1093 = vmatprep.subr.bf16.mxu1 %v1092_v7  ;;  %v349_v13 = vpop.f32.mrb[5].mxu1 }
 0x1fa   :  { %962 = vmatprep.mubr.f32.mxu1 %v349_v13 }
 0x1fc   :  { %1095 = vmatpush3.bf16.msra.mxu1 %v1092_v7  ;;  %v853_v16 = vpop.f32.mrb[6].mxu1 }
 0x1fd   :  { %1097 = vmatprep.subr.bf16.mxu1 %v1096_v12  ;;  %v359_v18 = vpop.f32.mrb[7].mxu1 }
 0x200   :  { %1099 = vmatpush3.bf16.msra.mxu1 %v1096_v12 }
 0x201   :  { %1101 = vmatprep.subr.bf16.mxu1 %v1100_v17 }
 0x204   :  { %1103 = vmatpush3.bf16.msra.mxu1 %v1100_v17 }
 0x205   :  { %1105 = vmatprep.subr.bf16.mxu1 %v1104_v21 }
 0x208   :  { %1107 = vmatpush3.bf16.msra.mxu1 %v1104_v21 }
 0x209   :  { %1109 = vmatprep.subr.bf16.mxu1 %v1108_v24 }
 0x20c   :  { %1111 = vmatpush3.bf16.msra.mxu1 %v1108_v24 }
 0x20d   :  { %1113 = vmatprep.subr.bf16.mxu1 %v1112_v27 }
 0x210   :  { %1115 = vmatpush3.bf16.msra.mxu1 %v1112_v27 }
 0x213   :  { %963 = vmatmul.mubr.f32.vlgmr.msra.gmra.mrb[8].mxu1 %v850_v11 }
 0x214   :  { %965 = vmatprep.mubr.f32.mxu1 %v359_v18 }
 0x217   :  { %966 = vmatmul.mubr.f32.gmra.mrb[10].mxu1 %v853_v16 }
 0x2e6   :  { %v964_v28 = vpop.f32.mrb[8].mxu1 }
 0x2e7   :  { %v1116_v30 = vadd.f32 %v964_v28, %v888_v59  ;;  %v654_v31 = vpop.f32.mrb[9].mxu1 }
 0x2e8   :  { %v1117_v32 = vadd.f32 %v654_v31, %v467_v60 }
 0x2e9   :  { %v685_v33 = vadd.f32 %v1116_v30, %v749_v29 }
 0x2ea   :  { %v684_v34 = vadd.f32 %v1117_v32, %v749_v29  ;;  %v967_v35 = vpop.f32.mrb[10].mxu1 }
 0x2eb   :  { %v689_v36 = vmax.f32 %v685_v33, 0.0  ;;  %v1118_v37 = vadd.f32 %v967_v35, %v1410_v61  ;;  %v664_v38 = vpop.f32.mrb[11].mxu1 }
 0x2ec   :  { %v688_v39 = vmax.f32 %v684_v34, 0.0  ;;  %v1119_v40 = vadd.f32 %v664_v38, %v1412_v62 }
 0x2ed   :  { %693 = vst [vmem:[%s1479_s6 + $0x8] sm:$0xff] %v689_v36  ;;  %v687_v41 = vadd.f32 %v1118_v37, %v749_v29 }
 0x2ee   :  { %692 = vst [vmem:[%s1479_s6] sm:$0xff] %v688_v39  ;;  %v686_v42 = vadd.f32 %v1119_v40, %v749_v29 }
 0x2ef   :  { %v691_v43 = vmax.f32 %v687_v41, 0.0 }
 0x2f0   :  { %v690_v44 = vmax.f32 %v686_v42, 0.0 }
 0x2f1   :  { %695 = vst [vmem:[%s1479_s6 + $0x18] sm:$0xff] %v691_v43 }
 0x2f2   :  { %694 = vst [vmem:[%s1479_s6 + $0x10] sm:$0xff] %v690_v44 }

</bundles_post_ra>
